<compile_context>
chip_gen: v7x
topology: tpu7x:2x2x1
jax: 0.10.0
libtpu: 0.0.40
codegen_flags: <defaults>
</compile_context>

<pallas_src>
import jax
import jax.numpy as jnp
from jax.experimental import pallas as pl
from jax.experimental.pallas import tpu as pltpu

N_CLASSES = 8
OUT_LANES = 128  # lane-dense packed output width


def _round_up(x, m):
    return ((x + m - 1) // m) * m


def tmc_kernel(x_ref, w_ref, out_ref):
    N = N_CLASSES
    # ---- single fused MXU matmul: packed block-diagonal head + folded bias ----
    logits = jnp.dot(x_ref[...], w_ref[...],
                     preferred_element_type=jnp.float32)      # (TB, 128)

    txt_logits = logits[:, 0:N]
    img_logits = logits[:, N:2 * N]

    # ---- evidence = softplus(logits); alpha = evidence + 1 ----
    txt_alpha = jnp.logaddexp(txt_logits, 0.0) + 1.0
    img_alpha = jnp.logaddexp(img_logits, 0.0) + 1.0

    # ---- DS_Combin_two (shared reciprocals factored out) ----
    C = jnp.float32(N_CLASSES)
    S0 = jnp.sum(txt_alpha, axis=1, keepdims=True)             # (TB, 1)
    S1 = jnp.sum(img_alpha, axis=1, keepdims=True)
    rS0 = 1.0 / S0
    rS1 = 1.0 / S1
    b0 = (txt_alpha - 1.0) * rS0                               # belief masses
    b1 = (img_alpha - 1.0) * rS1
    u0 = C * rS0                                               # uncertainties
    u1 = C * rS1
    # bmm(b0, b1^T): only its total sum and trace are needed.
    bb_sum = jnp.sum(b0, axis=1, keepdims=True) * jnp.sum(b1, axis=1, keepdims=True)
    bb_diag = jnp.sum(b0 * b1, axis=1, keepdims=True)
    Kc = bb_sum - bb_diag                                      # conflict
    one_mK = 1.0 - Kc
    r1mK = 1.0 / one_mK
    b_a = (b0 * b1 + b0 * u1 + b1 * u0) * r1mK
    # S_a = C / u_a  ==  S0 * S1 * (1 - K) / C  (drops one divide)
    S_a = S0 * S1 * one_mK * (1.0 / C)
    comb_alpha = b_a * S_a + 1.0

    # ---- lane-dense packed output: [txt | img | comb | zeros] ----
    out_ref[...] = jnp.zeros_like(out_ref)
    out_ref[:, 0:N] = txt_alpha
    out_ref[:, N:2 * N] = img_alpha
    out_ref[:, 2 * N:3 * N] = comb_alpha


def tmc_forward(txt_feat, img_feat, wt, bt, wi, bi):
    B, d_txt = txt_feat.shape
    d_img = img_feat.shape[1]
    N = N_CLASSES
    assert 3 * N <= OUT_LANES

    # Packed feature matrix: [txt | img | 1] (ones column carries the biases).
    K_raw = d_txt + d_img + 1
    K = _round_up(K_raw, 128)

    # Batch tile: 128 rows/step at scale; pad tiny batches up to a sublane multiple.
    TB = 128 if B >= 128 else _round_up(B, 8)
    B_pad = _round_up(B, TB)

    x = jnp.concatenate(
        [txt_feat.astype(jnp.float32),
         img_feat.astype(jnp.float32),
         jnp.ones((B, 1), jnp.float32)], axis=1)
    x = jnp.pad(x, ((0, B_pad - B), (0, K - K_raw)))           # (B_pad, K)

    # Block-diagonal packed weight with folded biases, zero-padded to 128 lanes.
    w = jnp.zeros((K, OUT_LANES), jnp.float32)
    w = w.at[:d_txt, 0:N].set(wt.astype(jnp.float32))
    w = w.at[d_txt:d_txt + d_img, N:2 * N].set(wi.astype(jnp.float32))
    w = w.at[d_txt + d_img, 0:N].set(bt.reshape(-1).astype(jnp.float32))
    w = w.at[d_txt + d_img, N:2 * N].set(bi.reshape(-1).astype(jnp.float32))

    grid = (B_pad // TB,)
    out = pl.pallas_call(
        tmc_kernel,
        out_shape=jax.ShapeDtypeStruct((B_pad, OUT_LANES), jnp.float32),
        grid_spec=pltpu.PrefetchScalarGridSpec(
            num_scalar_prefetch=0,
            grid=grid,
            in_specs=[
                pl.BlockSpec((TB, K), lambda i: (i, 0)),           # batch-tiled X
                pl.BlockSpec((K, OUT_LANES), lambda i: (0, 0)),    # resident weight
            ],
            out_specs=pl.BlockSpec((TB, OUT_LANES), lambda i: (i, 0)),
        ),
        compiler_params=pltpu.CompilerParams(
            dimension_semantics=("parallel",)),
    )(x, w)

    txt_alpha = out[:B, 0:N]
    img_alpha = out[:B, N:2 * N]
    comb_alpha = out[:B, 2 * N:3 * N]
    return txt_alpha, img_alpha, comb_alpha


# ---------------- pure-JAX reference (mirrors the PyTorch math) --------------
def _ds_combin_two_ref(a0, a1, n_classes):
    S0 = jnp.sum(a0, axis=1, keepdims=True)
    S1 = jnp.sum(a1, axis=1, keepdims=True)
    b0 = (a0 - 1.0) / S0
    b1 = (a1 - 1.0) / S1
    u0 = n_classes / S0
    u1 = n_classes / S1
    bb = jnp.einsum('bi,bj->bij', b0, b1)
    bb_sum = jnp.sum(bb, axis=(1, 2))
    bb_diag = jnp.trace(bb, axis1=-2, axis2=-1)
    K = (bb_sum - bb_diag)[:, None]
    b_a = (b0 * b1 + b0 * u1 + b1 * u0) / (1.0 - K)
    u_a = (u0 * u1) / (1.0 - K)
    S_a = n_classes / u_a
    return b_a * S_a + 1.0


def _ref(txt_feat, img_feat, wt, bt, wi, bi):
    tl = txt_feat @ wt + bt
    il = img_feat @ wi + bi
    ta = jax.nn.softplus(tl) + 1.0
    ia = jax.nn.softplus(il) + 1.0
    return ta, ia, _ds_combin_two_ref(ta, ia, float(N_CLASSES))


if __name__ == "__main__":
    key = jax.random.PRNGKey(0)
    kks = jax.random.split(key, 8)

    B, L, VOCAB, D_TXT = 8, 16, 50, 32          # text: batch, seq, vocab, emb dim
    C_IMG, H, W = 4, 16, 16                      # image NCHW
    D_IMG = C_IMG * H * W

    # ---- deterministic "parameters" ----
    emb_table = 0.05 * jax.random.normal(kks[0], (VOCAB, D_TXT), jnp.float32)
    wt = 0.1 * jax.random.normal(kks[1], (D_TXT, N_CLASSES), jnp.float32)
    bt = 0.01 * jax.random.normal(kks[2], (1, N_CLASSES), jnp.float32)
    wi = 0.02 * jax.random.normal(kks[3], (D_IMG, N_CLASSES), jnp.float32)
    bi = 0.01 * jax.random.normal(kks[4], (1, N_CLASSES), jnp.float32)

    # ---- deterministic inputs (txt ids, mask, segment, img NCHW) ----
    txt = jax.random.randint(kks[5], (B, L), 0, VOCAB)
    mask = jnp.ones((B, L), jnp.float32)
    segment = jnp.zeros((B, L), jnp.int32)       # TODO(synk): segment ids unused by stand-in encoder
    img = jax.random.normal(kks[6], (B, C_IMG, H, W), jnp.float32)

    # ---- glue (plain JAX): feature extraction stand-ins ----
    txt_emb = emb_table[txt]                                     # (B, L, D_TXT)
    txt_feat = (txt_emb * mask[..., None]).sum(1) / jnp.maximum(
        mask.sum(1, keepdims=True), 1.0)                         # (B, D_TXT)
    img_feat = img.reshape(B, D_IMG)                             # (B, C*H*W)

    outs = tmc_forward(txt_feat, img_feat, wt, bt, wi, bi)
    outs = jax.block_until_ready(outs)

    refs = _ref(txt_feat, img_feat, wt, bt, wi, bi)
    for o, r in zip(outs, refs):
        assert jnp.allclose(o, r, rtol=1e-5, atol=1e-5), "mismatch vs reference"

    print("KERNEL_OK")
</pallas_src>

<mosaic_0001>
module attributes {stable_mosaic.version = 11 : i64} {
  func.func @tmc_kernel(%arg0: i32, %arg1: memref<8x1152xf32, #tpu.memory_space<vmem>>, %arg2: memref<1152x128xf32, #tpu.memory_space<vmem>>, %arg3: memref<8x128xf32, #tpu.memory_space<vmem>>) attributes {dimension_semantics = [#tpu.dimension_semantics<parallel>], iteration_bounds = array<i64: 1>, scalar_prefetch = 0 : i64, scratch_operands = 0 : i64, tpu.core_type = #tpu.core_type<tc>, window_params = [{transform_indices = @transform_0, window_bounds = array<i64: 8, 1152>}, {pipeline_mode = #tpu.pipeline_mode<synchronous>, transform_indices = @transform_1, window_bounds = array<i64: 1152, 128>}, {transform_indices = @transform_2, window_bounds = array<i64: 8, 128>}]} {
    %c0 = arith.constant 0 : index
    %c0_0 = arith.constant 0 : index
    %0 = vector.load %arg1[%c0, %c0_0] : memref<8x1152xf32, #tpu.memory_space<vmem>>, vector<8x1152xf32>
    %c0_1 = arith.constant 0 : index
    %c0_2 = arith.constant 0 : index
    %1 = vector.load %arg2[%c0_1, %c0_2] : memref<1152x128xf32, #tpu.memory_space<vmem>>, vector<1152x128xf32>
    %cst = arith.constant dense<0.000000e+00> : vector<8x128xf32>
    %2 = tpu.matmul %0, %1, %cst {dimension_numbers = #tpu.dot_dimension_numbers<[1], [0], [0], [1], [0, 0, 1, 1], [], []>} : vector<8x1152xf32>, vector<1152x128xf32>, vector<8x128xf32> -> vector<8x128xf32>
    %3 = vector.extract_strided_slice %2 {offsets = [0, 0], sizes = [8, 8], strides = [1, 1]} : vector<8x128xf32> to vector<8x8xf32>
    %4 = vector.extract_strided_slice %2 {offsets = [0, 8], sizes = [8, 8], strides = [1, 1]} : vector<8x128xf32> to vector<8x8xf32>
    %cst_3 = arith.constant 0.000000e+00 : f32
    %5 = vector.broadcast %cst_3 : f32 to vector<8x8xf32>
    %6 = arith.maximumf %3, %5 : vector<8x8xf32>
    %7 = vector.broadcast %cst_3 : f32 to vector<8x8xf32>
    %8 = arith.subf %3, %7 : vector<8x8xf32>
    %9 = arith.cmpf one, %8, %8 : vector<8x8xf32>
    %10 = vector.broadcast %cst_3 : f32 to vector<8x8xf32>
    %11 = arith.addf %3, %10 : vector<8x8xf32>
    %12 = math.absf %8 : vector<8x8xf32>
    %cst_4 = arith.constant 0.000000e+00 : f32
    %13 = vector.broadcast %cst_4 : f32 to vector<8x8xf32>
    %14 = arith.subf %13, %12 : vector<8x8xf32>
    %15 = math.exp %14 : vector<8x8xf32>
    %16 = math.log1p %15 : vector<8x8xf32>
    %17 = arith.addf %6, %16 : vector<8x8xf32>
    %18 = arith.select %9, %11, %17 : vector<8x8xi1>, vector<8x8xf32>
    %cst_5 = arith.constant 1.000000e+00 : f32
    %19 = vector.broadcast %cst_5 : f32 to vector<8x8xf32>
    %20 = arith.addf %18, %19 : vector<8x8xf32>
    %cst_6 = arith.constant 0.000000e+00 : f32
    %21 = vector.broadcast %cst_6 : f32 to vector<8x8xf32>
    %22 = arith.maximumf %4, %21 : vector<8x8xf32>
    %23 = vector.broadcast %cst_6 : f32 to vector<8x8xf32>
    %24 = arith.subf %4, %23 : vector<8x8xf32>
    %25 = arith.cmpf one, %24, %24 : vector<8x8xf32>
    %26 = vector.broadcast %cst_6 : f32 to vector<8x8xf32>
    %27 = arith.addf %4, %26 : vector<8x8xf32>
    %28 = math.absf %24 : vector<8x8xf32>
    %cst_7 = arith.constant 0.000000e+00 : f32
    %29 = vector.broadcast %cst_7 : f32 to vector<8x8xf32>
    %30 = arith.subf %29, %28 : vector<8x8xf32>
    %31 = math.exp %30 : vector<8x8xf32>
    %32 = math.log1p %31 : vector<8x8xf32>
    %33 = arith.addf %22, %32 : vector<8x8xf32>
    %34 = arith.select %25, %27, %33 : vector<8x8xi1>, vector<8x8xf32>
    %cst_8 = arith.constant 1.000000e+00 : f32
    %35 = vector.broadcast %cst_8 : f32 to vector<8x8xf32>
    %36 = arith.addf %34, %35 : vector<8x8xf32>
    %cst_9 = arith.constant dense<0.000000e+00> : vector<8xf32>
    %37 = vector.multi_reduction <add>, %20, %cst_9 [1] : vector<8x8xf32> to vector<8xf32>
    %38 = vector.shape_cast %37 : vector<8xf32> to vector<8x1xf32>
    %cst_10 = arith.constant dense<0.000000e+00> : vector<8xf32>
    %39 = vector.multi_reduction <add>, %36, %cst_10 [1] : vector<8x8xf32> to vector<8xf32>
    %40 = vector.shape_cast %39 : vector<8xf32> to vector<8x1xf32>
    %cst_11 = arith.constant 1.000000e+00 : f32
    %41 = vector.broadcast %cst_11 : f32 to vector<8x1xf32>
    %42 = arith.divf %41, %38 : vector<8x1xf32>
    %cst_12 = arith.constant 1.000000e+00 : f32
    %43 = vector.broadcast %cst_12 : f32 to vector<8x1xf32>
    %44 = arith.divf %43, %40 : vector<8x1xf32>
    %cst_13 = arith.constant 1.000000e+00 : f32
    %45 = vector.broadcast %cst_13 : f32 to vector<8x8xf32>
    %46 = arith.subf %20, %45 : vector<8x8xf32>
    %47 = vector.broadcast %42 : vector<8x1xf32> to vector<8x8xf32>
    %48 = arith.mulf %46, %47 : vector<8x8xf32>
    %cst_14 = arith.constant 1.000000e+00 : f32
    %49 = vector.broadcast %cst_14 : f32 to vector<8x8xf32>
    %50 = arith.subf %36, %49 : vector<8x8xf32>
    %51 = vector.broadcast %44 : vector<8x1xf32> to vector<8x8xf32>
    %52 = arith.mulf %50, %51 : vector<8x8xf32>
    %cst_15 = arith.constant 8.000000e+00 : f32
    %53 = vector.broadcast %cst_15 : f32 to vector<8x1xf32>
    %54 = arith.mulf %53, %42 : vector<8x1xf32>
    %cst_16 = arith.constant 8.000000e+00 : f32
    %55 = vector.broadcast %cst_16 : f32 to vector<8x1xf32>
    %56 = arith.mulf %55, %44 : vector<8x1xf32>
    %cst_17 = arith.constant dense<0.000000e+00> : vector<8xf32>
    %57 = vector.multi_reduction <add>, %48, %cst_17 [1] : vector<8x8xf32> to vector<8xf32>
    %58 = vector.shape_cast %57 : vector<8xf32> to vector<8x1xf32>
    %cst_18 = arith.constant dense<0.000000e+00> : vector<8xf32>
    %59 = vector.multi_reduction <add>, %52, %cst_18 [1] : vector<8x8xf32> to vector<8xf32>
    %60 = vector.shape_cast %59 : vector<8xf32> to vector<8x1xf32>
    %61 = arith.mulf %58, %60 : vector<8x1xf32>
    %62 = arith.mulf %48, %52 : vector<8x8xf32>
    %cst_19 = arith.constant dense<0.000000e+00> : vector<8xf32>
    %63 = vector.multi_reduction <add>, %62, %cst_19 [1] : vector<8x8xf32> to vector<8xf32>
    %64 = vector.shape_cast %63 : vector<8xf32> to vector<8x1xf32>
    %65 = arith.subf %61, %64 : vector<8x1xf32>
    %cst_20 = arith.constant 1.000000e+00 : f32
    %66 = vector.broadcast %cst_20 : f32 to vector<8x1xf32>
    %67 = arith.subf %66, %65 : vector<8x1xf32>
    %cst_21 = arith.constant 1.000000e+00 : f32
    %68 = vector.broadcast %cst_21 : f32 to vector<8x1xf32>
    %69 = arith.divf %68, %67 : vector<8x1xf32>
    %70 = arith.mulf %48, %52 : vector<8x8xf32>
    %71 = vector.broadcast %56 : vector<8x1xf32> to vector<8x8xf32>
    %72 = arith.mulf %48, %71 : vector<8x8xf32>
    %73 = arith.addf %70, %72 : vector<8x8xf32>
    %74 = vector.broadcast %54 : vector<8x1xf32> to vector<8x8xf32>
    %75 = arith.mulf %52, %74 : vector<8x8xf32>
    %76 = arith.addf %73, %75 : vector<8x8xf32>
    %77 = vector.broadcast %69 : vector<8x1xf32> to vector<8x8xf32>
    %78 = arith.mulf %76, %77 : vector<8x8xf32>
    %79 = arith.mulf %38, %40 : vector<8x1xf32>
    %80 = arith.mulf %79, %67 : vector<8x1xf32>
    %cst_22 = arith.constant 1.000000e+00 : f32
    %cst_23 = arith.constant 8.000000e+00 : f32
    %81 = arith.divf %cst_22, %cst_23 : f32
    %82 = vector.broadcast %81 : f32 to vector<8x1xf32>
    %83 = arith.mulf %80, %82 : vector<8x1xf32>
    %84 = vector.broadcast %83 : vector<8x1xf32> to vector<8x8xf32>
    %85 = arith.mulf %78, %84 : vector<8x8xf32>
    %cst_24 = arith.constant 1.000000e+00 : f32
    %86 = vector.broadcast %cst_24 : f32 to vector<8x8xf32>
    %87 = arith.addf %85, %86 : vector<8x8xf32>
    %cst_25 = arith.constant 0.000000e+00 : f32
    %88 = vector.broadcast %cst_25 : f32 to vector<8x128xf32>
    %c0_26 = arith.constant 0 : index
    %c0_27 = arith.constant 0 : index
    %89 = vector.load %arg3[%c0_26, %c0_27] : memref<8x128xf32, #tpu.memory_space<vmem>>, vector<8x128xf32>
    tpu.vector_store %arg3[%c0_26, %c0_27], %88 {strides = array<i32>} : memref<8x128xf32, #tpu.memory_space<vmem>>, vector<8x128xf32>,
    %c0_28 = arith.constant 0 : index
    %c0_29 = arith.constant 0 : index
    %90 = vector.load %arg3[%c0_28, %c0_29] : memref<8x128xf32, #tpu.memory_space<vmem>>, vector<8x8xf32>
    tpu.vector_store %arg3[%c0_28, %c0_29], %20 {strides = array<i32>} : memref<8x128xf32, #tpu.memory_space<vmem>>, vector<8x8xf32>,
    %c0_30 = arith.constant 0 : index
    %c8 = arith.constant 8 : index
    %91 = vector.load %arg3[%c0_30, %c8] : memref<8x128xf32, #tpu.memory_space<vmem>>, vector<8x8xf32>
    tpu.vector_store %arg3[%c0_30, %c8], %36 {strides = array<i32>} : memref<8x128xf32, #tpu.memory_space<vmem>>, vector<8x8xf32>,
    %c0_31 = arith.constant 0 : index
    %c16 = arith.constant 16 : index
    %92 = vector.load %arg3[%c0_31, %c16] : memref<8x128xf32, #tpu.memory_space<vmem>>, vector<8x8xf32>
    tpu.vector_store %arg3[%c0_31, %c16], %87 {strides = array<i32>} : memref<8x128xf32, #tpu.memory_space<vmem>>, vector<8x8xf32>,
    return
  }
  func.func @transform_0(%arg0: i32) -> (i32, i32) {
    %c0_i32 = arith.constant 0 : i32
    %c0_i32_0 = arith.constant 0 : i32
    return %arg0, %c0_i32 : i32, i32
  }
  func.func @transform_1(%arg0: i32) -> (i32, i32) {
    %c0_i32 = arith.constant 0 : i32
    %c0_i32_0 = arith.constant 0 : i32
    %c0_i32_1 = arith.constant 0 : i32
    return %c0_i32, %c0_i32_0 : i32, i32
  }
  func.func @transform_2(%arg0: i32) -> (i32, i32) {
    %c0_i32 = arith.constant 0 : i32
    %c0_i32_0 = arith.constant 0 : i32
    return %arg0, %c0_i32 : i32, i32
  }
}

</mosaic_0001>

<bundles_post_ra>
// kernel: tpu_custom_call.1
= control target key start
LH: loop header
LB: loop body
LE: loop exit
PB: predicated region body
PF: predicated region fallthrough
CT: control target
= control target key end

     0   :  { %7 = vsyncpa [#allocation3], 0  ;;  %s1155_s0 = inlined_call_operand.hbm [shape: f32[8,1152], index: 0, kind: input, shape index: {}]   ;;  %s1156_s1 = inlined_call_operand.hbm [shape: f32[1152,128], index: 1, kind: input, shape index: {}]   ;;  %s1157_s2 = inlined_call_operand.hbm [shape: f32[8,128], index: 2, kind: output, shape index: {}]  }
   0x1   :  { %8 = vsyncpa [#allocation6], 0 }
   0x2   :  { %9 = vsyncpa [#allocation4], 0  ;;  %s1076_s9 = smov [#allocation2]   ;;  %s1077_s11 = smov [#allocation5]  }
   0x3   :  { %s16_s10 = sshll.u32 %s1076_s9, 4  ;;  %s25_s12 = sshll.u32 %s1077_s11, 4  ;;  %s17_s10 = int_to_ptr.vmem [resolvable:$true] %s16_s10  ;;  %s1101_s12 = int_to_ptr.vmem [resolvable:$true] %s25_s12 }
   0x4   :  { %s1004_s15 = scalar_lea.hbm %s1155_s0, 1152 }
   0x5   :  { %p1005_p0 = scmp.ne.s32.totalorder %s1155_s0, %s1004_s15  ;;  %p1008_p1 = scmp.lt.u32.totalorder %s1004_s15, %s1155_s0 }
   0x7   :  { %p1010_p2 = pnand %p1008_p1, %p1005_p0 }
   0x9   :  { %1013 = shalt.err (!%p1010_p2)
}
   0xa   :  { %s1014_s20 = scalar_lea.vmem %s17_s10, 1152  ;;  %p1019_p4 = scmp.lt.s32.totalorder %s17_s10, %s17_s10 }
   0xb   :  { %p1015_p3 = scmp.ne.s32.totalorder %s17_s10, %s1014_s20  ;;  %p1020_p5 = scmp.lt.s32.totalorder %s1014_s20, %s1014_s20 }
   0xd   :  { %p1021_p6 = por %p1020_p5, %p1019_p4 }
   0xf   :  { %p1022_p7 = pnand %p1021_p6, %p1015_p3 }
  0x11   :  { %1025 = shalt.err (!%p1022_p7)
}
  0x12   :  { %19 = dma.hbm_to_vmem [thread:$0]  %s1155_s0, 1152, %s17_s10, [#allocation3]  }
  0x13   :  { %s1026_s25 = scalar_lea.hbm %s1156_s1, 18432 }
  0x14   :  { %p1027_p8 = scmp.ne.s32.totalorder %s1156_s1, %s1026_s25  ;;  %p1030_p9 = scmp.lt.u32.totalorder %s1026_s25, %s1156_s1 }
  0x16   :  { %p1032_p10 = pnand %p1030_p9, %p1027_p8 }
  0x18   :  { %1035 = shalt.err (!%p1032_p10)
}
  0x19   :  { %s1036_s30 = scalar_lea.vmem %s1101_s12, 18432  ;;  %p1041_p12 = scmp.lt.s32.totalorder %s1101_s12, %s1101_s12 }
  0x1a   :  { %p1037_p11 = scmp.ne.s32.totalorder %s1101_s12, %s1036_s30  ;;  %p1042_p13 = scmp.lt.s32.totalorder %s1036_s30, %s1036_s30 }
  0x1c   :  { %p1043_p0 = por %p1042_p13, %p1041_p12 }
  0x1e   :  { %p1044_p1 = pnand %p1043_p0, %p1037_p11 }
  0x20   :  { %1047 = shalt.err (!%p1044_p1)
}
  0x21   :  { %s1078_s0 = smov 128   ;;  %s1079_s3 = smov 8  }
  0x22   :  { %31 = dma.hbm_to_vmem [thread:$0]  %s1156_s1, 18432, %s1101_s12, [#allocation6], %s1078_s0, %s1078_s0, %s1079_s3  }
  0x23   :  { %1070 = dma.done.wait [#allocation3], 1152  }
  0x24   :  { %1071 = vsyncadd [#allocation3], 4294966144 }
  0x25   :  { %1072 = dma.done.wait [#allocation6], 18432  }
  0x26   :  { %1073 = vsyncadd [#allocation6], 4294948864  ;;  %v1080_v0 = vmov 0.0   ;;  %v63_v1 = vld [vmem:[#allocation5 + $0x80] sm:$0xff]  ;;  %v64_v2 = vld [vmem:[#allocation5 + $0x88] sm:$0xff]  ;;  %vm1082_vm0 = vmmov 0  }
  0x27   :  { %613 = vst [vmem:[#allocation7] sm:$0xff] %v1080_v0  ;;  %v95_v3 = vld [vmem:[#allocation5 + $0x180] sm:$0xff]  ;;  %v832_v4 = vpack.c.bf16 %v64_v2, %v63_v1  ;;  %v96_v5 = vld [vmem:[#allocation5 + $0x188] sm:$0xff]  ;;  %v65_v12 = vld [vmem:[#allocation5 + $0x90] sm:$0xff]  ;;  %vm560_vm3 = vcmask 64512   ;;  %vm615_vm4 = vcmask 130112  }
  0x28   :  { %v47_v6 = vld [vmem:[#allocation5] sm:$0xff]  ;;  %v48_v7 = vld [vmem:[#allocation5 + $0x8] sm:$0xff]  ;;  %v864_v8 = vpack.c.bf16 %v96_v5, %v95_v3  ;;  %v66_v14 = vld [vmem:[#allocation5 + $0x98] sm:$0xff]  ;;  %s1083_s1 = smov 120   ;;  %s1084_s6 = smov 16   ;;  %vm621_vm5 = vcmask 195712  }
  0x29   :  { %v834_v9 = vpack.c.bf16 %v48_v7, %v47_v6  ;;  %v79_v10 = vld [vmem:[#allocation5 + $0x100] sm:$0xff]  ;;  %v80_v11 = vld [vmem:[#allocation5 + $0x108] sm:$0xff]  ;;  %833 = vmatprep.subr.bf16.mxu0 %v832_v4  ;;  %v97_v15 = vld [vmem:[#allocation5 + $0x190] sm:$0xff]  ;;  %v836_v17 = vpack.c.bf16 %v66_v14, %v65_v12  ;;  %s1085_s7 = smov [#allocation7]  }
  0x2a   :  { %v866_v13 = vpack.c.bf16 %v80_v11, %v79_v10  ;;  %v98_v16 = vld [vmem:[#allocation5 + $0x198] sm:$0xff]  ;;  %865 = vmatprep.subr.bf16.mxu1 %v864_v8  ;;  %v49_v19 = vld [vmem:[#allocation5 + $0x10] sm:$0xff]  ;;  %v67_v24 = vld [vmem:[#allocation5 + $0xa0] sm:$0xff]  ;;  %s629_s8 = sshll.u32 %s1085_s7, 4  ;;  %s630_s8 = int_to_ptr.vmem [resolvable:$true] %s629_s8 }
  0x2b   :  { %835 = vmatpush3.bf16.msra.mxu0 %v834_v9  ;;  %v868_v18 = vpack.c.bf16 %v98_v16, %v97_v15  ;;  %v50_v20 = vld [vmem:[#allocation5 + $0x18] sm:$0xff]  ;;  %v81_v21 = vld [vmem:[#allocation5 + $0x110] sm:$0xff]  ;;  %v68_v25 = vld [vmem:[#allocation5 + $0xa8] sm:$0xff]  ;;  %s1048_s9 = scalar_lea.vmem %s630_s8, 128  ;;  %p1053_p3 = scmp.lt.s32.totalorder %s630_s8, %s630_s8 }
  0x2c   :  { %867 = vmatpush3.bf16.msra.mxu1 %v866_v13  ;;  %v838_v22 = vpack.c.bf16 %v50_v20, %v49_v19  ;;  %v82_v23 = vld [vmem:[#allocation5 + $0x118] sm:$0xff]  ;;  %837 = vmatprep.subr.bf16.mxu0 %v836_v17  ;;  %v840_v27 = vpack.c.bf16 %v68_v25, %v67_v24  ;;  %v99_v28 = vld [vmem:[#allocation5 + $0x1a0] sm:$0xff]  ;;  %v100_v29 = vld [vmem:[#allocation5 + $0x1a8] sm:$0xff]  ;;  %p1049_p2 = scmp.ne.s32.totalorder %s630_s8, %s1048_s9  ;;  %p1054_p4 = scmp.lt.s32.totalorder %s1048_s9, %s1048_s9 }
  0x2d   :  { %869 = vmatprep.subr.bf16.mxu1 %v868_v18  ;;  %v870_v26 = vpack.c.bf16 %v82_v23, %v81_v21  ;;  %v51_v30 = vld [vmem:[#allocation5 + $0x20] sm:$0xff]  ;;  %v872_v31 = vpack.c.bf16 %v100_v29, %v99_v28  ;;  %v52_v32 = vld [vmem:[#allocation5 + $0x28] sm:$0xff]  ;;  %v69_v36 = vld [vmem:[#allocation5 + $0xb0] sm:$0xff] }
  0x2e   :  { %v83_v33 = vld [vmem:[#allocation5 + $0x120] sm:$0xff]  ;;  %v84_v34 = vld [vmem:[#allocation5 + $0x128] sm:$0xff]  ;;  %v842_v35 = vpack.c.bf16 %v52_v32, %v51_v30  ;;  %v70_v37 = vld [vmem:[#allocation5 + $0xb8] sm:$0xff]  ;;  %p1055_p5 = por %p1054_p4, %p1053_p3 }
  0x2f   :  { %839 = vmatpush3.bf16.msra.mxu0 %v838_v22  ;;  %v101_v38 = vld [vmem:[#allocation5 + $0x1b0] sm:$0xff]  ;;  %v874_v39 = vpack.c.bf16 %v84_v34, %v83_v33  ;;  %v844_v40 = vpack.c.bf16 %v70_v37, %v69_v36  ;;  %v102_v41 = vld [vmem:[#allocation5 + $0x1b8] sm:$0xff]  ;;  %v71_v47 = vld [vmem:[#allocation5 + $0xc0] sm:$0xff] }
  0x30   :  { %871 = vmatpush3.bf16.msra.mxu1 %v870_v26  ;;  %841 = vmatprep.subr.bf16.mxu0 %v840_v27  ;;  %v53_v42 = vld [vmem:[#allocation5 + $0x30] sm:$0xff]  ;;  %v54_v43 = vld [vmem:[#allocation5 + $0x38] sm:$0xff]  ;;  %v876_v44 = vpack.c.bf16 %v102_v41, %v101_v38  ;;  %v72_v48 = vld [vmem:[#allocation5 + $0xc8] sm:$0xff]  ;;  %p1056_p6 = pnand %p1055_p5, %p1049_p2 }
  0x31   :  { %873 = vmatprep.subr.bf16.mxu1 %v872_v31  ;;  %v85_v45 = vld [vmem:[#allocation5 + $0x130] sm:$0xff]  ;;  %v86_v46 = vld [vmem:[#allocation5 + $0x138] sm:$0xff]  ;;  %v103_v49 = vld [vmem:[#allocation5 + $0x1c0] sm:$0xff]  ;;  %v846_v51 = vpack.c.bf16 %v54_v43, %v53_v42  ;;  %v848_v53 = vpack.c.bf16 %v72_v48, %v71_v47 }
  0x32   :  { %v104_v50 = vld [vmem:[#allocation5 + $0x1c8] sm:$0xff]  ;;  %v878_v52 = vpack.c.bf16 %v86_v46, %v85_v45  ;;  %v55_v54 = vld [vmem:[#allocation5 + $0x40] sm:$0xff]  ;;  %v73_v59 = vld [vmem:[#allocation5 + $0xd0] sm:$0xff] }
  0x33   :  { %843 = vmatpush3.bf16.msra.mxu0 %v842_v35  ;;  %v56_v55 = vld [vmem:[#allocation5 + $0x48] sm:$0xff]  ;;  %v87_v56 = vld [vmem:[#allocation5 + $0x140] sm:$0xff]  ;;  %v880_v57 = vpack.c.bf16 %v104_v50, %v103_v49  ;;  %v74_v60 = vld [vmem:[#allocation5 + $0xd8] sm:$0xff] }
  0x34   :  { %875 = vmatpush3.bf16.msra.mxu1 %v874_v39  ;;  %845 = vmatprep.subr.bf16.mxu0 %v844_v40  ;;  %v88_v58 = vld [vmem:[#allocation5 + $0x148] sm:$0xff]  ;;  %v105_v61 = vld [vmem:[#allocation5 + $0x1d0] sm:$0xff]  ;;  %v106_v62 = vld [vmem:[#allocation5 + $0x1d8] sm:$0xff]  ;;  %v850_v63 = vpack.c.bf16 %v56_v55, %v55_v54  ;;  %v852_v2 = vpack.c.bf16 %v74_v60, %v73_v59 }
  0x35   :  { %877 = vmatprep.subr.bf16.mxu1 %v876_v44  ;;  %v882_v1 = vpack.c.bf16 %v88_v58, %v87_v56  ;;  %v57_v3 = vld [vmem:[#allocation5 + $0x50] sm:$0xff]  ;;  %v58_v4 = vld [vmem:[#allocation5 + $0x58] sm:$0xff]  ;;  %v884_v6 = vpack.c.bf16 %v106_v62, %v105_v61  ;;  %v75_v8 = vld [vmem:[#allocation5 + $0xe0] sm:$0xff] }
  0x36   :  { %v89_v5 = vld [vmem:[#allocation5 + $0x150] sm:$0xff]  ;;  %v90_v7 = vld [vmem:[#allocation5 + $0x158] sm:$0xff]  ;;  %v76_v9 = vld [vmem:[#allocation5 + $0xe8] sm:$0xff]  ;;  %v854_v12 = vpack.c.bf16 %v58_v4, %v57_v3 }
  0x37   :  { %847 = vmatpush3.bf16.msra.mxu0 %v846_v51  ;;  %v107_v10 = vld [vmem:[#allocation5 + $0x1e0] sm:$0xff]  ;;  %v108_v11 = vld [vmem:[#allocation5 + $0x1e8] sm:$0xff]  ;;  %v886_v15 = vpack.c.bf16 %v90_v7, %v89_v5  ;;  %v856_v16 = vpack.c.bf16 %v76_v9, %v75_v8  ;;  %v41_v19 = vld [vmem:[#allocation2 + $0x18] sm:$0xff] }
  0x38   :  { %879 = vmatpush3.bf16.msra.mxu1 %v878_v52  ;;  %849 = vmatprep.subr.bf16.mxu0 %v848_v53  ;;  %v59_v13 = vld [vmem:[#allocation5 + $0x60] sm:$0xff]  ;;  %v60_v14 = vld [vmem:[#allocation5 + $0x68] sm:$0xff]  ;;  %v888_v20 = vpack.c.bf16 %v108_v11, %v107_v10  ;;  %v77_v22 = vld [vmem:[#allocation5 + $0xf0] sm:$0xff] }
  0x39   :  { %881 = vmatprep.subr.bf16.mxu1 %v880_v57  ;;  %v91_v17 = vld [vmem:[#allocation5 + $0x160] sm:$0xff]  ;;  %v92_v21 = vld [vmem:[#allocation5 + $0x168] sm:$0xff]  ;;  %v78_v23 = vld [vmem:[#allocation5 + $0xf8] sm:$0xff]  ;;  %325 = vmatprep.mubr.f32.mxu1 %v41_v19  ;;  %v858_v26 = vpack.c.bf16 %v60_v14, %v59_v13 }
  0x3a   :  { %v39_v18 = vld [vmem:[#allocation2 + $0x8] sm:$0xff]  ;;  %v109_v24 = vld [vmem:[#allocation5 + $0x1f0] sm:$0xff]  ;;  %v110_v25 = vld [vmem:[#allocation5 + $0x1f8] sm:$0xff]  ;;  %v890_v27 = vpack.c.bf16 %v92_v21, %v91_v17  ;;  %v860_v28 = vpack.c.bf16 %v78_v23, %v77_v22 }
  0x3b   :  { %851 = vmatpush3.bf16.msra.mxu0 %v850_v63  ;;  %255 = vmatprep.mubr.f32.mxu0 %v39_v18  ;;  %v61_v29 = vld [vmem:[#allocation5 + $0x70] sm:$0xff]  ;;  %v62_v30 = vld [vmem:[#allocation5 + $0x78] sm:$0xff]  ;;  %v892_v32 = vpack.c.bf16 %v110_v25, %v109_v24  ;;  %v127_v34 = vld [vmem:[#allocation5 + $0x280] sm:$0xff] }
  0x3c   :  { %883 = vmatpush3.bf16.msra.mxu1 %v882_v1  ;;  %853 = vmatprep.subr.bf16.mxu0 %v852_v2  ;;  %v93_v31 = vld [vmem:[#allocation5 + $0x170] sm:$0xff]  ;;  %v94_v33 = vld [vmem:[#allocation5 + $0x178] sm:$0xff]  ;;  %v128_v35 = vld [vmem:[#allocation5 + $0x288] sm:$0xff]  ;;  %v862_v38 = vpack.c.bf16 %v62_v30, %v61_v29 }
  0x3d   :  { %885 = vmatprep.subr.bf16.mxu1 %v884_v6  ;;  %v159_v36 = vld [vmem:[#allocation5 + $0x380] sm:$0xff]  ;;  %v160_v37 = vld [vmem:[#allocation5 + $0x388] sm:$0xff]  ;;  %v894_v39 = vpack.c.bf16 %v94_v33, %v93_v31  ;;  %v896_v40 = vpack.c.bf16 %v128_v35, %v127_v34  ;;  %v129_v46 = vld [vmem:[#allocation5 + $0x290] sm:$0xff] }
  0x3e   :  { %v111_v41 = vld [vmem:[#allocation5 + $0x200] sm:$0xff]  ;;  %v112_v42 = vld [vmem:[#allocation5 + $0x208] sm:$0xff]  ;;  %v928_v44 = vpack.c.bf16 %v160_v37, %v159_v36  ;;  %v130_v47 = vld [vmem:[#allocation5 + $0x298] sm:$0xff] }
  0x3f   :  { %855 = vmatpush3.bf16.msra.mxu0 %v854_v12  ;;  %v143_v43 = vld [vmem:[#allocation5 + $0x300] sm:$0xff]  ;;  %v144_v45 = vld [vmem:[#allocation5 + $0x308] sm:$0xff]  ;;  %v161_v48 = vld [vmem:[#allocation5 + $0x390] sm:$0xff]  ;;  %v898_v52 = vpack.c.bf16 %v112_v42, %v111_v41  ;;  %v900_v54 = vpack.c.bf16 %v130_v47, %v129_v46 }
  0x40   :  { %887 = vmatpush3.bf16.msra.mxu1 %v886_v15  ;;  %857 = vmatprep.subr.bf16.mxu0 %v856_v16  ;;  %v162_v49 = vld [vmem:[#allocation5 + $0x398] sm:$0xff]  ;;  %v40_v51 = vld [vmem:[#allocation2 + $0x10] sm:$0xff]  ;;  %v930_v53 = vpack.c.bf16 %v144_v45, %v143_v43  ;;  %v113_v55 = vld [vmem:[#allocation5 + $0x210] sm:$0xff] }
  0x41   :  { %889 = vmatprep.subr.bf16.mxu1 %v888_v20  ;;  %v38_v50 = vld [vmem:[#allocation2] sm:$0xff]  ;;  %v145_v57 = vld [vmem:[#allocation5 + $0x310] sm:$0xff]  ;;  %v932_v58 = vpack.c.bf16 %v162_v49, %v161_v48  ;;  %v131_v60 = vld [vmem:[#allocation5 + $0x2a0] sm:$0xff] }
  0x42   :  { %v114_v56 = vld [vmem:[#allocation5 + $0x218] sm:$0xff]  ;;  %v132_v61 = vld [vmem:[#allocation5 + $0x2a8] sm:$0xff]  ;;  %v163_v62 = vld [vmem:[#allocation5 + $0x3a0] sm:$0xff] }
  0x43   :  { %859 = vmatpush3.bf16.msra.mxu0 %v858_v26  ;;  %v146_v59 = vld [vmem:[#allocation5 + $0x318] sm:$0xff]  ;;  %v164_v63 = vld [vmem:[#allocation5 + $0x3a8] sm:$0xff]  ;;  %v902_v1 = vpack.c.bf16 %v114_v56, %v113_v55  ;;  %v904_v3 = vpack.c.bf16 %v132_v61, %v131_v60  ;;  %v115_v4 = vld [vmem:[#allocation5 + $0x220] sm:$0xff] }
  0x44   :  { %891 = vmatpush3.bf16.msra.mxu1 %v890_v27  ;;  %861 = vmatprep.subr.bf16.mxu0 %v860_v28  ;;  %v934_v2 = vpack.c.bf16 %v146_v59, %v145_v57  ;;  %v116_v5 = vld [vmem:[#allocation5 + $0x228] sm:$0xff]  ;;  %v147_v6 = vld [vmem:[#allocation5 + $0x320] sm:$0xff]  ;;  %v936_v7 = vpack.c.bf16 %v164_v63, %v163_v62  ;;  %v133_v9 = vld [vmem:[#allocation5 + $0x2b0] sm:$0xff] }
  0x45   :  { %893 = vmatprep.subr.bf16.mxu1 %v892_v32  ;;  %v148_v8 = vld [vmem:[#allocation5 + $0x328] sm:$0xff]  ;;  %v134_v10 = vld [vmem:[#allocation5 + $0x2b8] sm:$0xff]  ;;  %v165_v11 = vld [vmem:[#allocation5 + $0x3b0] sm:$0xff]  ;;  %v906_v13 = vpack.c.bf16 %v116_v5, %v115_v4 }
  0x46   :  { %v166_v12 = vld [vmem:[#allocation5 + $0x3b8] sm:$0xff]  ;;  %v938_v14 = vpack.c.bf16 %v148_v8, %v147_v6  ;;  %v908_v15 = vpack.c.bf16 %v134_v10, %v133_v9  ;;  %v117_v16 = vld [vmem:[#allocation5 + $0x230] sm:$0xff]  ;;  %v135_v21 = vld [vmem:[#allocation5 + $0x2c0] sm:$0xff] }
  0x47   :  { %863 = vmatpush3.bf16.msra.mxu0 %v862_v38  ;;  %v118_v17 = vld [vmem:[#allocation5 + $0x238] sm:$0xff]  ;;  %v149_v18 = vld [vmem:[#allocation5 + $0x330] sm:$0xff]  ;;  %v940_v19 = vpack.c.bf16 %v166_v12, %v165_v11  ;;  %v136_v22 = vld [vmem:[#allocation5 + $0x2c8] sm:$0xff] }
  0x48   :  { %895 = vmatpush3.bf16.msra.mxu1 %v894_v39  ;;  %897 = vmatprep.subr.bf16.mxu0 %v896_v40  ;;  %v150_v20 = vld [vmem:[#allocation5 + $0x338] sm:$0xff]  ;;  %v167_v23 = vld [vmem:[#allocation5 + $0x3c0] sm:$0xff]  ;;  %v168_v24 = vld [vmem:[#allocation5 + $0x3c8] sm:$0xff]  ;;  %v910_v26 = vpack.c.bf16 %v118_v17, %v117_v16  ;;  %v912_v29 = vpack.c.bf16 %v136_v22, %v135_v21 }
  0x49   :  { %929 = vmatprep.subr.bf16.mxu1 %v928_v44  ;;  %v43_v25 = vld [vmem:[#allocation2 + $0x28] sm:$0xff]  ;;  %v45_v27 = vld [vmem:[#allocation2 + $0x38] sm:$0xff]  ;;  %v942_v28 = vpack.c.bf16 %v150_v20, %v149_v18  ;;  %v120_v31 = vld [vmem:[#allocation5 + $0x248] sm:$0xff]  ;;  %v944_v33 = vpack.c.bf16 %v168_v24, %v167_v23 }
  0x4a   :  { %256 = vmatmul.mubr.f32.vlgmr.msra.gmra.mrb[0].mxu0 %v38_v50  ;;  %v119_v30 = vld [vmem:[#allocation5 + $0x240] sm:$0xff]  ;;  %v152_v34 = vld [vmem:[#allocation5 + $0x348] sm:$0xff]  ;;  %v137_v35 = vld [vmem:[#allocation5 + $0x2d0] sm:$0xff] }
  0x4b   :  { %326 = vmatmul.mubr.f32.vlgmr.msra.gmra.mrb[0].mxu1 %v40_v51  ;;  %899 = vmatpush3.bf16.msra.mxu0 %v898_v52  ;;  %v151_v32 = vld [vmem:[#allocation5 + $0x340] sm:$0xff]  ;;  %v138_v36 = vld [vmem:[#allocation5 + $0x2d8] sm:$0xff]  ;;  %v169_v37 = vld [vmem:[#allocation5 + $0x3d0] sm:$0xff]  ;;  %v914_v39 = vpack.c.bf16 %v120_v31, %v119_v30 }
  0x4c   :  { %931 = vmatpush3.bf16.msra.mxu1 %v930_v53  ;;  %901 = vmatprep.subr.bf16.mxu0 %v900_v54  ;;  %v170_v38 = vld [vmem:[#allocation5 + $0x3d8] sm:$0xff]  ;;  %v946_v40 = vpack.c.bf16 %v152_v34, %v151_v32  ;;  %v916_v41 = vpack.c.bf16 %v138_v36, %v137_v35  ;;  %v121_v42 = vld [vmem:[#allocation5 + $0x250] sm:$0xff]  ;;  %v139_v47 = vld [vmem:[#allocation5 + $0x2e0] sm:$0xff] }
  0x4d   :  { %933 = vmatprep.subr.bf16.mxu1 %v932_v58  ;;  %395 = vmatprep.mubr.f32.mxu0 %v43_v25  ;;  %v122_v43 = vld [vmem:[#allocation5 + $0x258] sm:$0xff]  ;;  %v153_v44 = vld [vmem:[#allocation5 + $0x350] sm:$0xff]  ;;  %v948_v45 = vpack.c.bf16 %v170_v38, %v169_v37  ;;  %v140_v48 = vld [vmem:[#allocation5 + $0x2e8] sm:$0xff] }
  0x4e   :  { %465 = vmatprep.mubr.f32.mxu1 %v45_v27  ;;  %v154_v46 = vld [vmem:[#allocation5 + $0x358] sm:$0xff]  ;;  %v171_v49 = vld [vmem:[#allocation5 + $0x3e0] sm:$0xff]  ;;  %v172_v50 = vld [vmem:[#allocation5 + $0x3e8] sm:$0xff]  ;;  %v918_v51 = vpack.c.bf16 %v122_v43, %v121_v42  ;;  %v920_v53 = vpack.c.bf16 %v140_v48, %v139_v47 }
  0x4f   :  { %903 = vmatpush3.bf16.msra.mxu0 %v902_v1  ;;  %v950_v52 = vpack.c.bf16 %v154_v46, %v153_v44  ;;  %v123_v54 = vld [vmem:[#allocation5 + $0x260] sm:$0xff]  ;;  %v124_v55 = vld [vmem:[#allocation5 + $0x268] sm:$0xff]  ;;  %v952_v57 = vpack.c.bf16 %v172_v50, %v171_v49  ;;  %v141_v59 = vld [vmem:[#allocation5 + $0x2f0] sm:$0xff] }
  0x50   :  { %935 = vmatpush3.bf16.msra.mxu1 %v934_v2  ;;  %905 = vmatprep.subr.bf16.mxu0 %v904_v3  ;;  %v155_v56 = vld [vmem:[#allocation5 + $0x360] sm:$0xff]  ;;  %v156_v58 = vld [vmem:[#allocation5 + $0x368] sm:$0xff]  ;;  %v142_v60 = vld [vmem:[#allocation5 + $0x2f8] sm:$0xff]  ;;  %v922_v63 = vpack.c.bf16 %v124_v55, %v123_v54 }
  0x51   :  { %937 = vmatprep.subr.bf16.mxu1 %v936_v7  ;;  %v173_v61 = vld [vmem:[#allocation5 + $0x3f0] sm:$0xff]  ;;  %v174_v62 = vld [vmem:[#allocation5 + $0x3f8] sm:$0xff]  ;;  %v954_v1 = vpack.c.bf16 %v156_v58, %v155_v56  ;;  %v924_v2 = vpack.c.bf16 %v142_v60, %v141_v59  ;;  %v175_v10 = vld [vmem:[#allocation5 + $0x400] sm:$0xff] }
  0x52   :  { %v125_v3 = vld [vmem:[#allocation5 + $0x270] sm:$0xff]  ;;  %v126_v4 = vld [vmem:[#allocation5 + $0x278] sm:$0xff]  ;;  %v956_v5 = vpack.c.bf16 %v174_v62, %v173_v61  ;;  %v176_v11 = vld [vmem:[#allocation5 + $0x408] sm:$0xff] }
  0x53   :  { %907 = vmatpush3.bf16.msra.mxu0 %v906_v13  ;;  %v157_v6 = vld [vmem:[#allocation5 + $0x370] sm:$0xff]  ;;  %v158_v7 = vld [vmem:[#allocation5 + $0x378] sm:$0xff]  ;;  %v926_v8 = vpack.c.bf16 %v126_v4, %v125_v3  ;;  %v961_v13 = vpack.c.bf16 %v176_v11, %v175_v10  ;;  %v180_v20 = vld [vmem:[#allocation5 + $0x428] sm:$0xff] }
  0x54   :  { %939 = vmatpush3.bf16.msra.mxu1 %v938_v14  ;;  %909 = vmatprep.subr.bf16.mxu0 %v908_v15  ;;  %v958_v9 = vpack.c.bf16 %v158_v7, %v157_v6  ;;  %v42_v12 = vld [vmem:[#allocation2 + $0x20] sm:$0xff]  ;;  %v1081_v14 = vmov 0.0|0.0   ;;  %v44_v15 = vld [vmem:[#allocation2 + $0x30] sm:$0xff]  ;;  %v177_v16 = vld [vmem:[#allocation5 + $0x410] sm:$0xff] }
  0x55   :  { %941 = vmatprep.subr.bf16.mxu1 %v940_v19  ;;  %v178_v17 = vld [vmem:[#allocation5 + $0x418] sm:$0xff]  ;;  %v179_v19 = vld [vmem:[#allocation5 + $0x420] sm:$0xff]  ;;  %v181_v22 = vld [vmem:[#allocation5 + $0x430] sm:$0xff] }
  0x56   :  { %v964_v18 = vpack.c.bf16 %v178_v17, %v177_v16  ;;  %v967_v21 = vpack.c.bf16 %v180_v20, %v179_v19  ;;  %v182_v23 = vld [vmem:[#allocation5 + $0x438] sm:$0xff]  ;;  %v183_v25 = vld [vmem:[#allocation5 + $0x440] sm:$0xff] }
  0x57   :  { %911 = vmatpush3.bf16.msra.mxu0 %v910_v26  ;;  %v970_v24 = vpack.c.bf16 %v182_v23, %v181_v22  ;;  %v184_v26 = vld [vmem:[#allocation5 + $0x448] sm:$0xff]  ;;  %v187_v31 = vld [vmem:[#allocation5 + $0x460] sm:$0xff]  ;;  %v190_v34 = vld [vmem:[#allocation5 + $0x478] sm:$0xff] }
  0x58   :  { %943 = vmatpush3.bf16.msra.mxu1 %v942_v28  ;;  %913 = vmatprep.subr.bf16.mxu0 %v912_v29  ;;  %v973_v27 = vpack.c.bf16 %v184_v26, %v183_v25  ;;  %v185_v28 = vld [vmem:[#allocation5 + $0x450] sm:$0xff]  ;;  %v186_v29 = vld [vmem:[#allocation5 + $0x458] sm:$0xff] }
  0x59   :  { %945 = vmatprep.subr.bf16.mxu1 %v944_v33  ;;  %v976_v30 = vpack.c.bf16 %v186_v29, %v185_v28  ;;  %v189_v33 = vld [vmem:[#allocation5 + $0x470] sm:$0xff]  ;;  %v46_v36 = vld [vmem:[#allocation2 + $0x40] sm:$0xff] }
  0x5a   :  { %v982_v35 = vpack.c.bf16 %v190_v34, %v189_v33 }
  0x5b   :  { %915 = vmatpush3.bf16.msra.mxu0 %v914_v39 }
  0x5c   :  { %947 = vmatpush3.bf16.msra.mxu1 %v946_v40  ;;  %917 = vmatprep.subr.bf16.mxu0 %v916_v41 }
  0x5d   :  { %949 = vmatprep.subr.bf16.mxu1 %v948_v45 }
  0x5f   :  { %919 = vmatpush3.bf16.msra.mxu0 %v918_v51 }
  0x60   :  { %951 = vmatpush3.bf16.msra.mxu1 %v950_v52  ;;  %921 = vmatprep.subr.bf16.mxu0 %v920_v53 }
  0x61   :  { %953 = vmatprep.subr.bf16.mxu1 %v952_v57 }
  0x63   :  { %923 = vmatpush3.bf16.msra.mxu0 %v922_v63 }
  0x64   :  { %955 = vmatpush3.bf16.msra.mxu1 %v954_v1  ;;  %925 = vmatprep.subr.bf16.mxu0 %v924_v2 }
  0x65   :  { %957 = vmatprep.subr.bf16.mxu1 %v956_v5 }
  0x67   :  { %927 = vmatpush3.bf16.msra.mxu0 %v926_v8 }
  0x68   :  { %959 = vmatpush3.bf16.msra.mxu1 %v958_v9  ;;  %960 = vmatprep.subr.bf16.mxu0 %v1081_v14 }
  0x6a   :  { %396 = vmatmul.mubr.f32.vlgmr.msra.gmra.mrb[2].mxu0 %v42_v12 }
  0x6b   :  { %962 = vmatpush3.bf16.msra.mxu0 %v961_v13  ;;  %466 = vmatmul.mubr.f32.vlgmr.msra.gmra.mrb[2].mxu1 %v44_v15 }
  0x6c   :  { %963 = vmatprep.subr.bf16.mxu0 %v1081_v14  ;;  %829 = vmatprep.mubr.msk.f32.mxu0 %vm1082_vm0, %v1080_v0  ;;  %v188_v0 = vld [vmem:[#allocation5 + $0x468] sm:$0xff] }
  0x6d   :  { %v979_v32 = vpack.c.bf16 %v188_v0, %v187_v31 }
  0x6f   :  { %965 = vmatpush3.bf16.msra.mxu0 %v964_v18 }
  0x70   :  { %966 = vmatprep.subr.bf16.mxu0 %v1081_v14 }
  0x73   :  { %968 = vmatpush3.bf16.msra.mxu0 %v967_v21 }
  0x74   :  { %969 = vmatprep.subr.bf16.mxu0 %v1081_v14 }
  0x77   :  { %971 = vmatpush3.bf16.msra.mxu0 %v970_v24 }
  0x78   :  { %972 = vmatprep.subr.bf16.mxu0 %v1081_v14 }
  0x7b   :  { %974 = vmatpush3.bf16.msra.mxu0 %v973_v27 }
  0x7c   :  { %975 = vmatprep.subr.bf16.mxu0 %v1081_v14 }
  0x7f   :  { %977 = vmatpush3.bf16.msra.mxu0 %v976_v30 }
  0x80   :  { %978 = vmatprep.subr.bf16.mxu0 %v1081_v14 }
  0x83   :  { %980 = vmatpush3.bf16.msra.mxu0 %v979_v32 }
  0x84   :  { %981 = vmatprep.subr.bf16.mxu0 %v1081_v14 }
  0x87   :  { %983 = vmatpush3.bf16.msra.mxu0 %v982_v35 }
  0x8a   :  { %830 = vmatmul.mubr.f32.vlgmr.msra.gmra.mrb[4].mxu0 %v46_v36 }
 0x11d   :  { %v672_v37 = vpop.f32.mrb[0].mxu0 }
 0x11e   :  { %v707_v38 = vpop.f32.mrb[0].mxu1  ;;  %v673_v39 = vpop.f32.mrb[1].mxu0 }
 0x11f   :  { %v674_v40 = vadd.f32 %v673_v39, %v672_v37  ;;  %v708_v41 = vpop.f32.mrb[1].mxu1 }
 0x120   :  { %v709_v42 = vadd.f32 %v708_v41, %v707_v38 }
 0x122   :  { %v328_v43 = vadd.f32 %v709_v42, %v674_v40 }
 0x13d   :  { %v742_v44 = vpop.f32.mrb[2].mxu0 }
 0x13e   :  { %v743_v45 = vpop.f32.mrb[3].mxu0  ;;  %v777_v46 = vpop.f32.mrb[2].mxu1 }
 0x13f   :  { %v744_v47 = vadd.f32 %v743_v45, %v742_v44  ;;  %v778_v48 = vpop.f32.mrb[3].mxu1 }
 0x140   :  { %v779_v49 = vadd.f32 %v778_v48, %v777_v46 }
 0x141   :  { %v398_v50 = vadd.f32 %v744_v47, %v328_v43 }
 0x143   :  { %v468_v51 = vadd.f32 %v779_v49, %v398_v50 }
 0x15d   :  { %v537_v52 = vpop.f32.mrb[4].mxu0 }
 0x15e   :  { %v538_v53 = vadd.f32 %v537_v52, %v468_v51  ;;  %v831_v54 = vpop.f32.mrb[5].mxu0 }
 0x160   :  { %v544_v55 = vand.u32 2147483647, %v538_v53  ;;  %v541_v3 = vmax.f32 %v538_v53, 0.0  ;;  %vm542_vm2 = vcmp.ne.f32.partialorder %v538_v53, %v538_v53 }
 0x162   :  { %v545_v56 = vsub.f32 0.0, %v544_v55 }
 0x164   :  { %v546_v57 = vmul.f32 1.442695, %v545_v56 }
 0x166   :  { %994 = vpow2.f32 %v546_v57 }
 0x170   :  { %v995_v58 = vpop.eup %994 }
 0x171   :  { %v548_v59 = vadd.f32 1.0, %v995_v58  ;;  %v551_v60 = vmul.f32 -0.5, %v995_v58  ;;  %v554_v62 = vand.u32 2147483647, %v995_v58 }
 0x173   :  { %996 = vlog2.f32 %v548_v59  ;;  %v552_v61 = vadd.f32 1.0, %v551_v60  ;;  %vm555_vm1 = vcmp.lt.f32.partialorder %v554_v62, 0.0004427343 }
 0x175   :  { %v553_v2 = vmul.f32 %v995_v58, %v552_v61 }
 0x17d   :  { %v997_v63 = vpop.eup %996 }
 0x17e   :  { %v550_v1 = vmul.f32 0.6931472, %v997_v63 }
 0x180   :  { %v556_v4 = vsel %vm555_vm1, %v553_v2, %v550_v1 }
 0x181   :  { %v557_v5 = vadd.f32 %v556_v4, %v541_v3 }
 0x183   :  { %v558_v6 = vsel %vm542_vm2, %v538_v53, %v557_v5 }
 0x184   :  { %v559_v7 = vadd.f32 1.0, %v558_v6 }
 0x186   :  { %565 = vrot.lane.b32.xlu0 %v559_v7, %s1083_s1  ;;  %v561_v8 = vsel %vm560_vm3, %v559_v7, 0.0  ;;  %614 = vst.msk [vmem:[#allocation7] sm:$0xff] %vm560_vm3, %v559_v7  ;;  %v639_v14 = vadd.f32 -1.0, %v559_v7 }
 0x187   :  { %562 = vadd.xlane.f32.xlu1 %v561_v8  ;;  %616 = vst.msk [vmem:[#allocation7] sm:$0xff] %vm615_vm4, %v559_v7 }
 0x1f8   :  { %v566_v9 = vpop.permute.xlu0 %565 }
 0x1f9   :  { %v568_v10 = vsel %vm560_vm3, %v566_v9, 0.0 }
 0x1fa   :  { %569 = vadd.xlane.f32.xlu0 %v568_v10 }
 0x214   :  { %v563_v11 = vpop.xlane.xlu1 %562 }
 0x215   :  { %998 = vrcp.f32 %v563_v11 }
 0x21f   :  { %v999_v13 = vpop.eup %998 }
 0x220   :  { %v578_v17 = vmul.f32 8.0, %v999_v13  ;;  %v576_v19 = vmul.f32 %v999_v13, %v639_v14 }
 0x222   :  { %v580_v20 = vsel %vm560_vm3, %v576_v19, 0.0 }
 0x287   :  { %v570_v12 = vpop.xlane.xlu0 %569 }
 0x288   :  { %1000 = vrcp.f32 %v570_v12  ;;  %v608_v33 = vmul.f32 %v570_v12, %v563_v11 }
 0x292   :  { %v1001_v15 = vpop.eup %1000 }
 0x293   :  { %v577_v16 = vmul.f32 %v1001_v15, %v639_v14  ;;  %v579_v21 = vmul.f32 8.0, %v1001_v15 }
 0x295   :  { %584 = vrot.lane.b32.xlu1 %v577_v16, %s1083_s1  ;;  %v601_v18 = vmul.f32 %v578_v17, %v577_v16  ;;  %v599_v25 = vmul.f32 %v579_v21, %v576_v19 }
 0x2b9   :  { %581 = vadd.xlane.f32.xlu1 %v580_v20 }
 0x307   :  { %v585_v22 = vpop.permute.xlu1 %584 }
 0x308   :  { %v591_v23 = vmul.f32 %v585_v22, %v576_v19  ;;  %v587_v24 = vsel %vm560_vm3, %v585_v22, 0.0 }
 0x309   :  { %588 = vadd.xlane.f32.xlu0 %v587_v24 }
 0x30a   :  { %v600_v26 = vadd.f32 %v599_v25, %v591_v23  ;;  %v592_v27 = vsel %vm560_vm3, %v591_v23, 0.0 }
 0x30d   :  { %593 = vadd.xlane.f32.xlu0 %v592_v27 }
 0x323   :  { %603 = vrot.lane.b32.xlu0 %v601_v18, %s1083_s1 }
 0x346   :  { %v582_v29 = vpop.xlane.xlu1 %581 }
 0x396   :  { %v589_v28 = vpop.xlane.xlu0 %588 }
 0x397   :  { %v590_v30 = vmul.f32 %v589_v28, %v582_v29 }
 0x39a   :  { %v594_v31 = vpop.xlane.xlu0 %593 }
 0x39b   :  { %v595_v0 = vsub.f32 %v590_v30, %v594_v31 }
 0x39d   :  { %v596_v32 = vsub.f32 1.0, %v595_v0 }
 0x39e   :  { %v604_v34 = vpop.permute.xlu0 %603 }
 0x39f   :  { %1002 = vrcp.f32 %v596_v32  ;;  %v609_v35 = vmul.f32 %v608_v33, %v596_v32  ;;  %v606_v36 = vadd.f32 %v604_v34, %v600_v26 }
 0x3a1   :  { %v610_v38 = vmul.f32 0.125, %v609_v35 }
 0x3a9   :  { %v1003_v37 = vpop.eup %1002 }
 0x3aa   :  { %v607_v39 = vmul.f32 %v1003_v37, %v606_v36 }
 0x3ac   :  { %v611_v40 = vmul.f32 %v610_v38, %v607_v39 }
 0x3ae   :  { %v612_v41 = vadd.f32 1.0, %v611_v40 }
 0x3b0   :  { %618 = vrot.lane.b32.xlu1 %v612_v41, %s1084_s6 }
 0x422   :  { %v619_v42 = vpop.permute.xlu1 %618 }
 0x423   :  { %622 = vst.msk [vmem:[#allocation7] sm:$0xff] %vm621_vm5, %v619_v42 }
 0x424   :  { %1059 = shalt.err (!%p1056_p6)
}
 0x425   :  { %s1060_s12 = scalar_lea.hbm %s1157_s2, 128 }
 0x426   :  { %p1061_p7 = scmp.ne.s32.totalorder %s1157_s2, %s1060_s12  ;;  %p1064_p8 = scmp.lt.u32.totalorder %s1060_s12, %s1157_s2 }
 0x428   :  { %p1066_p9 = pnand %p1064_p8, %p1061_p7 }
 0x42a   :  { %1069 = shalt.err (!%p1066_p9)
}
 0x42b   :  { %632 = dma.vmem_to_hbm [thread:$0]  %s630_s8, 128, %s1157_s2, [#allocation4]  }
 0x42c   :  { %1074 = dma.done.wait [#allocation4], 128  }
 0x42d   :  { %1075 = vsyncadd [#allocation4], 4294967168 }
 0x42e   :  { %636 = vsyncpa [#allocation3], 1 }
 0x42f   :  { %637 = vsyncpa [#allocation6], 1 }
 0x430   :  { %638 = vsyncpa [#allocation4], 1 }

</bundles_post_ra>
